<compile_context>
chip_gen: v6e
topology: v6e:2x2x1
jax: 0.10.0
libtpu: 0.0.40
codegen_flags: <defaults>
</compile_context>

<pallas_src>
import jax
import jax.numpy as jnp
from jax.experimental import pallas as pl
from jax.experimental.pallas import tpu as pltpu

IN_DIM = 1
HID_DIM = 8
OUT_DIM = 1
LANES = 128            # fast (lane) axis of a vreg
MAX_BLOCK_ROWS = 4096  # 4096 x 128 f32 = 2 MiB per tile


def mlp_kernel(x_ref, a_ref, c0_ref, cj_ref, dj_ref, o_ref):
    # x_ref / o_ref: (block_rows, 128) f32 in VMEM, batch samples on lanes.
    # a_ref, c0_ref: (1,) f32 in SMEM;  cj_ref, dj_ref: (8,) f32 in SMEM.
    x = x_ref[...]
    # Fused linear part of all ReLUs + both biases (also serves as acc init).
    acc = x * a_ref[0] + c0_ref[0]
    # Unrolled over the 8 hidden units: add + abs + mul + add per unit (VPU).
    for j in range(HID_DIM):
        acc = acc + dj_ref[j] * jnp.abs(x + cj_ref[j])
    o_ref[...] = acc.astype(o_ref.dtype)


def _round_up8(n):
    return max(8, -(-n // 8) * 8)


def mlp_forward(x, w1, b1, w2, b2):
    """x: [N, 1] -> [N, 1] float32.  Any N (ragged handled by a pad fallback).

    w1: [1, 8], b1: [1, 8], w2: [8, 1], b2: [1, 1] stored [in, out], i.e.
    y = relu(x @ w1 + b1) @ w2 + b2 (same math as the PyTorch module).
    """
    N = x.shape[0]
    xf = x.reshape(-1).astype(jnp.float32)  # [N] scalars, f32 at the boundary

    # ---- derived per-unit scalars (tiny wrapper-side jnp ops) -------------
    w1f = w1.reshape(HID_DIM).astype(jnp.float32)
    b1f = b1.reshape(HID_DIM).astype(jnp.float32)
    w2f = w2.reshape(HID_DIM).astype(jnp.float32)
    b2f = b2.reshape(()).astype(jnp.float32)

    nz = w1f != 0.0
    safe_w1 = jnp.where(nz, w1f, 1.0)
    A = 0.5 * jnp.sum(jnp.where(nz, w2f * w1f, 0.0))
    C = (0.5 * jnp.sum(jnp.where(nz, w2f * b1f, 0.0))
         + jnp.sum(jnp.where(nz, 0.0, w2f * jnp.maximum(b1f, 0.0)))  # w1_j==0 units
         + b2f)
    cj = jnp.where(nz, b1f / safe_w1, 0.0)
    dj = jnp.where(nz, 0.5 * w2f * jnp.abs(w1f), 0.0)

    a_s = A.reshape(1)
    c0_s = C.reshape(1)

    # ---- grid / block sizing ----------------------------------------------
    rows = -(-N // LANES)          # lane-rows needed
    rows8 = _round_up8(rows)       # sublane-aligned
    num_blocks = pl.cdiv(rows8, MAX_BLOCK_ROWS)
    # Guarantee >= 2 (ideally 4) grid steps on v7x so both TensorCores stream.
    if rows8 >= 4 * 8:
        num_blocks = max(num_blocks, 4)
    elif rows8 >= 2 * 8:
        num_blocks = max(num_blocks, 2)
    if num_blocks > 1 and num_blocks % 2:
        num_blocks += 1            # even split across 2 TCs
    block_rows = _round_up8(pl.cdiv(rows8, num_blocks))
    rows_padded = num_blocks * block_rows
    total = rows_padded * LANES

    # ---- input slab: pure reshape fast path, pad only if ragged -----------
    if total == N:
        x2d = xf.reshape(rows_padded, LANES)          # no extra HBM pass
        needs_slice = False
    else:
        x2d = jnp.zeros((total,), jnp.float32).at[:N].set(xf).reshape(
            rows_padded, LANES)
        needs_slice = True

    out2d = pl.pallas_call(
        mlp_kernel,
        out_shape=jax.ShapeDtypeStruct((rows_padded, LANES), jnp.float32),
        grid_spec=pltpu.PrefetchScalarGridSpec(
            num_scalar_prefetch=0,
            grid=(num_blocks,),
            in_specs=[
                pl.BlockSpec((block_rows, LANES), lambda i: (i, 0)),  # x tile
                pl.BlockSpec(memory_space=pltpu.MemorySpace.SMEM),    # A
                pl.BlockSpec(memory_space=pltpu.MemorySpace.SMEM),    # C
                pl.BlockSpec(memory_space=pltpu.MemorySpace.SMEM),    # c_j
                pl.BlockSpec(memory_space=pltpu.MemorySpace.SMEM),    # d_j
            ],
            out_specs=pl.BlockSpec((block_rows, LANES), lambda i: (i, 0)),
        ),
        compiler_params=pltpu.CompilerParams(
            dimension_semantics=("parallel",),
        ),
    )(x2d, a_s, c0_s, cj, dj)

    if needs_slice:
        return out2d.reshape(-1)[:N].reshape(N, OUT_DIM)
    return out2d.reshape(N, OUT_DIM)                  # no extra HBM pass


def init_params(key):
    """Deterministic init mimicking nn.Linear's U(-1/sqrt(fan_in), 1/sqrt(fan_in))."""
    k1, k2, k3, k4 = jax.random.split(key, 4)
    bound1 = 1.0 / jnp.sqrt(IN_DIM)
    bound2 = 1.0 / jnp.sqrt(HID_DIM)
    w1 = jax.random.uniform(k1, (IN_DIM, HID_DIM), jnp.float32, -bound1, bound1)
    b1 = jax.random.uniform(k2, (1, HID_DIM), jnp.float32, -bound1, bound1)
    w2 = jax.random.uniform(k3, (HID_DIM, OUT_DIM), jnp.float32, -bound2, bound2)
    b2 = jax.random.uniform(k4, (1, OUT_DIM), jnp.float32, -bound2, bound2)
    return w1, b1, w2, b2


if __name__ == "__main__":
    key = jax.random.PRNGKey(0)
    kx, kp = jax.random.split(key)
    w1, b1, w2, b2 = init_params(kp)

    # One ragged batch (exercises the pad fallback) and one that hits the
    # pure-reshape fast path with a 2-step grid.
    for N in (300, 2048):
        x = jax.random.normal(jax.random.fold_in(kx, N), (N, IN_DIM), jnp.float32)
        out = mlp_forward(x, w1, b1, w2, b2)
        out = jax.block_until_ready(out)

        # Pure-JAX reference check of the fused kernel.
        ref = jnp.maximum(x @ w1 + b1, 0.0) @ w2 + b2
        assert out.shape == (N, OUT_DIM)
        assert jnp.allclose(out, ref, atol=1e-5, rtol=1e-5)

    print("KERNEL_OK")
</pallas_src>

<mosaic_0001>
module attributes {stable_mosaic.version = 11 : i64} {
  func.func @mlp_kernel(%arg0: i32, %arg1: memref<8x128xf32, #tpu.memory_space<vmem>>, %arg2: memref<1xf32, #tpu.memory_space<smem>>, %arg3: memref<1xf32, #tpu.memory_space<smem>>, %arg4: memref<8xf32, #tpu.memory_space<smem>>, %arg5: memref<8xf32, #tpu.memory_space<smem>>, %arg6: memref<8x128xf32, #tpu.memory_space<vmem>>) attributes {dimension_semantics = [#tpu.dimension_semantics<parallel>], iteration_bounds = array<i64: 1>, scalar_prefetch = 0 : i64, scratch_operands = 0 : i64, tpu.core_type = #tpu.core_type<tc>, window_params = [{transform_indices = @transform_0, window_bounds = array<i64: 8, 128>}, {transform_indices = @transform_1, window_bounds = array<i64: 1>}, {transform_indices = @transform_2, window_bounds = array<i64: 1>}, {transform_indices = @transform_3, window_bounds = array<i64: 8>}, {transform_indices = @transform_4, window_bounds = array<i64: 8>}, {transform_indices = @transform_5, window_bounds = array<i64: 8, 128>}]} {
    %c0 = arith.constant 0 : index
    %c0_0 = arith.constant 0 : index
    %0 = vector.load %arg1[%c0, %c0_0] : memref<8x128xf32, #tpu.memory_space<vmem>>, vector<8x128xf32>
    %c0_1 = arith.constant 0 : index
    %1 = memref.load %arg2[%c0_1] : memref<1xf32, #tpu.memory_space<smem>>
    %2 = vector.broadcast %1 : f32 to vector<8x128xf32>
    %3 = arith.mulf %0, %2 : vector<8x128xf32>
    %c0_2 = arith.constant 0 : index
    %4 = memref.load %arg3[%c0_2] : memref<1xf32, #tpu.memory_space<smem>>
    %5 = vector.broadcast %4 : f32 to vector<8x128xf32>
    %6 = arith.addf %3, %5 : vector<8x128xf32>
    %c0_3 = arith.constant 0 : index
    %7 = memref.load %arg5[%c0_3] : memref<8xf32, #tpu.memory_space<smem>>
    %c0_4 = arith.constant 0 : index
    %8 = memref.load %arg4[%c0_4] : memref<8xf32, #tpu.memory_space<smem>>
    %9 = vector.broadcast %8 : f32 to vector<8x128xf32>
    %10 = arith.addf %0, %9 : vector<8x128xf32>
    %11 = math.absf %10 : vector<8x128xf32>
    %12 = vector.broadcast %7 : f32 to vector<8x128xf32>
    %13 = arith.mulf %12, %11 : vector<8x128xf32>
    %14 = arith.addf %6, %13 : vector<8x128xf32>
    %c1 = arith.constant 1 : index
    %15 = memref.load %arg5[%c1] : memref<8xf32, #tpu.memory_space<smem>>
    %c1_5 = arith.constant 1 : index
    %16 = memref.load %arg4[%c1_5] : memref<8xf32, #tpu.memory_space<smem>>
    %17 = vector.broadcast %16 : f32 to vector<8x128xf32>
    %18 = arith.addf %0, %17 : vector<8x128xf32>
    %19 = math.absf %18 : vector<8x128xf32>
    %20 = vector.broadcast %15 : f32 to vector<8x128xf32>
    %21 = arith.mulf %20, %19 : vector<8x128xf32>
    %22 = arith.addf %14, %21 : vector<8x128xf32>
    %c2 = arith.constant 2 : index
    %23 = memref.load %arg5[%c2] : memref<8xf32, #tpu.memory_space<smem>>
    %c2_6 = arith.constant 2 : index
    %24 = memref.load %arg4[%c2_6] : memref<8xf32, #tpu.memory_space<smem>>
    %25 = vector.broadcast %24 : f32 to vector<8x128xf32>
    %26 = arith.addf %0, %25 : vector<8x128xf32>
    %27 = math.absf %26 : vector<8x128xf32>
    %28 = vector.broadcast %23 : f32 to vector<8x128xf32>
    %29 = arith.mulf %28, %27 : vector<8x128xf32>
    %30 = arith.addf %22, %29 : vector<8x128xf32>
    %c3 = arith.constant 3 : index
    %31 = memref.load %arg5[%c3] : memref<8xf32, #tpu.memory_space<smem>>
    %c3_7 = arith.constant 3 : index
    %32 = memref.load %arg4[%c3_7] : memref<8xf32, #tpu.memory_space<smem>>
    %33 = vector.broadcast %32 : f32 to vector<8x128xf32>
    %34 = arith.addf %0, %33 : vector<8x128xf32>
    %35 = math.absf %34 : vector<8x128xf32>
    %36 = vector.broadcast %31 : f32 to vector<8x128xf32>
    %37 = arith.mulf %36, %35 : vector<8x128xf32>
    %38 = arith.addf %30, %37 : vector<8x128xf32>
    %c4 = arith.constant 4 : index
    %39 = memref.load %arg5[%c4] : memref<8xf32, #tpu.memory_space<smem>>
    %c4_8 = arith.constant 4 : index
    %40 = memref.load %arg4[%c4_8] : memref<8xf32, #tpu.memory_space<smem>>
    %41 = vector.broadcast %40 : f32 to vector<8x128xf32>
    %42 = arith.addf %0, %41 : vector<8x128xf32>
    %43 = math.absf %42 : vector<8x128xf32>
    %44 = vector.broadcast %39 : f32 to vector<8x128xf32>
    %45 = arith.mulf %44, %43 : vector<8x128xf32>
    %46 = arith.addf %38, %45 : vector<8x128xf32>
    %c5 = arith.constant 5 : index
    %47 = memref.load %arg5[%c5] : memref<8xf32, #tpu.memory_space<smem>>
    %c5_9 = arith.constant 5 : index
    %48 = memref.load %arg4[%c5_9] : memref<8xf32, #tpu.memory_space<smem>>
    %49 = vector.broadcast %48 : f32 to vector<8x128xf32>
    %50 = arith.addf %0, %49 : vector<8x128xf32>
    %51 = math.absf %50 : vector<8x128xf32>
    %52 = vector.broadcast %47 : f32 to vector<8x128xf32>
    %53 = arith.mulf %52, %51 : vector<8x128xf32>
    %54 = arith.addf %46, %53 : vector<8x128xf32>
    %c6 = arith.constant 6 : index
    %55 = memref.load %arg5[%c6] : memref<8xf32, #tpu.memory_space<smem>>
    %c6_10 = arith.constant 6 : index
    %56 = memref.load %arg4[%c6_10] : memref<8xf32, #tpu.memory_space<smem>>
    %57 = vector.broadcast %56 : f32 to vector<8x128xf32>
    %58 = arith.addf %0, %57 : vector<8x128xf32>
    %59 = math.absf %58 : vector<8x128xf32>
    %60 = vector.broadcast %55 : f32 to vector<8x128xf32>
    %61 = arith.mulf %60, %59 : vector<8x128xf32>
    %62 = arith.addf %54, %61 : vector<8x128xf32>
    %c7 = arith.constant 7 : index
    %63 = memref.load %arg5[%c7] : memref<8xf32, #tpu.memory_space<smem>>
    %c7_11 = arith.constant 7 : index
    %64 = memref.load %arg4[%c7_11] : memref<8xf32, #tpu.memory_space<smem>>
    %65 = vector.broadcast %64 : f32 to vector<8x128xf32>
    %66 = arith.addf %0, %65 : vector<8x128xf32>
    %67 = math.absf %66 : vector<8x128xf32>
    %68 = vector.broadcast %63 : f32 to vector<8x128xf32>
    %69 = arith.mulf %68, %67 : vector<8x128xf32>
    %70 = arith.addf %62, %69 : vector<8x128xf32>
    %c0_12 = arith.constant 0 : index
    %c0_13 = arith.constant 0 : index
    %71 = vector.load %arg6[%c0_12, %c0_13] : memref<8x128xf32, #tpu.memory_space<vmem>>, vector<8x128xf32>
    tpu.vector_store %arg6[%c0_12, %c0_13], %70 {strides = array<i32>} : memref<8x128xf32, #tpu.memory_space<vmem>>, vector<8x128xf32>,
    return
  }
  func.func @transform_0(%arg0: i32) -> (i32, i32) {
    %c0_i32 = arith.constant 0 : i32
    %c0_i32_0 = arith.constant 0 : i32
    return %arg0, %c0_i32 : i32, i32
  }
  func.func @transform_1(%arg0: i32) -> i32 {
    %c0_i32 = arith.constant 0 : i32
    %c0_i32_0 = arith.constant 0 : i32
    return %c0_i32 : i32
  }
  func.func @transform_2(%arg0: i32) -> i32 {
    %c0_i32 = arith.constant 0 : i32
    %c0_i32_0 = arith.constant 0 : i32
    return %c0_i32 : i32
  }
  func.func @transform_3(%arg0: i32) -> i32 {
    %c0_i32 = arith.constant 0 : i32
    %c0_i32_0 = arith.constant 0 : i32
    return %c0_i32 : i32
  }
  func.func @transform_4(%arg0: i32) -> i32 {
    %c0_i32 = arith.constant 0 : i32
    %c0_i32_0 = arith.constant 0 : i32
    return %c0_i32 : i32
  }
  func.func @transform_5(%arg0: i32) -> (i32, i32) {
    %c0_i32 = arith.constant 0 : i32
    %c0_i32_0 = arith.constant 0 : i32
    return %arg0, %c0_i32 : i32, i32
  }
}

</mosaic_0001>

<bundles_post_ra>
// kernel: tpu_custom_call.1
= control target key start
LH: loop header
LB: loop body
LE: loop exit
PB: predicated region body
PF: predicated region fallthrough
CT: control target
= control target key end

     0   :  { %12 = vsyncpa [#allocation5], 0  ;;  %s312_s0 = inlined_call_operand.hbm [shape: f32[8,128], index: 0, kind: input, shape index: {}]   ;;  %s313_s1 = inlined_call_operand.<no memory space> [shape: f32[1], index: 1, kind: input, shape index: {}]   ;;  %s314_s2 = inlined_call_operand.<no memory space> [shape: f32[1], index: 2, kind: input, shape index: {}]   ;;  %s315_s3 = inlined_call_operand.vmem [shape: f32[8], index: 3, kind: input, shape index: {}]   ;;  %s316_s4 = inlined_call_operand.vmem [shape: f32[8], index: 4, kind: input, shape index: {}]   ;;  %s317_s5 = inlined_call_operand.hbm [shape: f32[8,128], index: 5, kind: output, shape index: {}]  }
   0x1   :  { %13 = vsyncpa [#allocation7], 0 }
   0x2   :  { %14 = vsyncpa [#allocation10], 0 }
   0x3   :  { %15 = vsyncpa [#allocation6], 0  ;;  %s36_s20 = sshll.u32 %s315_s3, 4  ;;  %s239_s21 = smov [#allocation4]   ;;  %s37_s20 = int_to_ptr.vmem [resolvable:$true] %s36_s20 }
   0x4   :  { %s22_s22 = sshll.u32 %s239_s21, 4  ;;  %s23_s22 = int_to_ptr.vmem [resolvable:$true] %s22_s22 }
   0x5   :  { %s175_s23 = scalar_lea.vmem %s23_s22, 128  ;;  %p180_p1 = scmp.lt.s32.totalorder %s23_s22, %s23_s22 }
   0x6   :  { %p176_p0 = scmp.ne.s32.totalorder %s23_s22, %s175_s23  ;;  %p181_p2 = scmp.lt.s32.totalorder %s175_s23, %s175_s23 }
   0x8   :  { %p182_p3 = por %p181_p2, %p180_p1 }
   0xa   :  { %p183_p4 = pnand %p182_p3, %p176_p0 }
   0xc   :  { %186 = shalt.err (!%p183_p4)
}
   0xd   :  { %25 = dma.hbm_to_vmem [thread:$0]  %s312_s0, 128, %s23_s22, [#allocation5]  }
   0xe   :  { %s187_s26 = scalar_lea.vmem %s37_s20, 16  ;;  %p192_p6 = scmp.lt.s32.totalorder %s37_s20, %s37_s20 }
   0xf   :  { %p188_p5 = scmp.ne.s32.totalorder %s37_s20, %s187_s26  ;;  %p193_p7 = scmp.lt.s32.totalorder %s187_s26, %s187_s26 }
  0x11   :  { %p194_p8 = por %p193_p7, %p192_p6 }
  0x13   :  { %p195_p9 = pnand %p194_p8, %p188_p5 }
  0x15   :  { %198 = shalt.err (!%p195_p9)
}
  0x16   :  { %s240_s3 = smov [#allocation8]   ;;  %s46_s29 = sshll.u32 %s316_s4, 4  ;;  %s47_s29 = int_to_ptr.vmem [resolvable:$true] %s46_s29 }
  0x17   :  { %39 = dma.vmem_to_smem %s37_s20, 16, %s240_s3, [#allocation7]  }
  0x18   :  { %s199_s30 = scalar_lea.vmem %s47_s29, 16  ;;  %p204_p11 = scmp.lt.s32.totalorder %s47_s29, %s47_s29 }
  0x19   :  { %p200_p10 = scmp.ne.s32.totalorder %s47_s29, %s199_s30  ;;  %p205_p12 = scmp.lt.s32.totalorder %s199_s30, %s199_s30 }
  0x1b   :  { %p206_p13 = por %p205_p12, %p204_p11 }
  0x1d   :  { %p207_p0 = pnand %p206_p13, %p200_p10 }
  0x1f   :  { %210 = shalt.err (!%p207_p0)
}
  0x20   :  { %s241_s0 = smov [#allocation9]  }
  0x21   :  { %49 = dma.vmem_to_smem %s47_s29, 16, %s241_s0, [#allocation10]  }
  0x22   :  { %231 = dma.done.wait [#allocation5], 128  }
  0x23   :  { %232 = vsyncadd [#allocation5], 4294967168 }
  0x24   :  { %233 = dma.done.wait [#allocation7], 16  }
  0x25   :  { %234 = vsyncadd [#allocation7], 4294967280 }
  0x26   :  { %235 = dma.done.wait [#allocation10], 16  }
  0x27   :  { %236 = vsyncadd [#allocation10], 4294967280 }
  0x28   :  { %59 = sfence }
  0x29   :  { %s67_s6 = sld [smem:[#allocation9]]  ;;  %v62_v0 = vstv %s313_s1  ;;  %v60_v1 = vld [vmem:[#allocation4] sm:$0xff]  ;;  %v65_v3 = vstv %s314_s2  ;;  %s242_s23 = smov [#allocation11]  }
  0x2a   :  { %s68_s7 = sld [smem:[#allocation8]]  ;;  %v63_v2 = vmul.f32 %v62_v0, %v60_v1  ;;  %s138_s24 = sshll.u32 %s242_s23, 4  ;;  %s139_s24 = int_to_ptr.vmem [resolvable:$true] %s138_s24 }
  0x2b   :  { %s282_s4 = sld [smem:[#allocation9 + $0x1]]  ;;  %s211_s25 = scalar_lea.vmem %s139_s24, 128 }
  0x2c   :  { %s150_s10 = sld [smem:[#allocation8 + $0x1]]  ;;  %v66_v8 = vadd.f32 %v65_v3, %v63_v2  ;;  %p212_p1 = scmp.ne.s32.totalorder %s139_s24, %s211_s25 }
  0x2d   :  { %s287_s11 = sld [smem:[#allocation9 + $0x2]]  ;;  %p216_p2 = scmp.lt.s32.totalorder %s139_s24, %s139_s24 }
  0x2e   :  { %s152_s12 = sld [smem:[#allocation8 + $0x2]]  ;;  %p217_p3 = scmp.lt.s32.totalorder %s211_s25, %s211_s25 }
  0x2f   :  { %s289_s13 = sld [smem:[#allocation9 + $0x3]]  ;;  %v72_v6 = vstv %s67_s6 }
  0x30   :  { %v69_v4 = vstv %s68_s7  ;;  %s154_s16 = sld [smem:[#allocation8 + $0x3]]  ;;  %p218_p4 = por %p217_p3, %p216_p2 }
  0x31   :  { %v70_v5 = vadd.f32 %v69_v4, %v60_v1  ;;  %s294_s17 = sld [smem:[#allocation9 + $0x4]]  ;;  %v80_v11 = vstv %s282_s4 }
  0x32   :  { %v77_v7 = vstv %s150_s10  ;;  %s156_s1 = sld [smem:[#allocation8 + $0x4]]  ;;  %p219_p5 = pnand %p218_p4, %p212_p1 }
  0x33   :  { %v71_v9 = vand.u32 2147483647, %v70_v5  ;;  %v78_v10 = vadd.f32 %v77_v7, %v60_v1  ;;  %s296_s18 = sld [smem:[#allocation9 + $0x5]]  ;;  %v88_v16 = vstv %s287_s11 }
  0x34   :  { %v85_v12 = vstv %s152_s12  ;;  %s158_s19 = sld [smem:[#allocation8 + $0x5]] }
  0x35   :  { %v73_v13 = vmul.f32 %v72_v6, %v71_v9  ;;  %v79_v14 = vand.u32 2147483647, %v78_v10  ;;  %v86_v15 = vadd.f32 %v85_v12, %v60_v1  ;;  %s299_s2 = sld [smem:[#allocation9 + $0x6]]  ;;  %v96_v22 = vstv %s289_s13 }
  0x36   :  { %v93_v17 = vstv %s154_s16  ;;  %s160_s20 = sld [smem:[#allocation8 + $0x6]] }
  0x37   :  { %v74_v18 = vadd.f32 %v73_v13, %v66_v8  ;;  %v81_v19 = vmul.f32 %v80_v11, %v79_v14  ;;  %v87_v20 = vand.u32 2147483647, %v86_v15  ;;  %v94_v21 = vadd.f32 %v93_v17, %v60_v1  ;;  %s302_s21 = sld [smem:[#allocation9 + $0x7]] }
  0x38   :  { %v101_v23 = vstv %s156_s1  ;;  %s162_s22 = sld [smem:[#allocation8 + $0x7]]  ;;  %v104_v28 = vstv %s294_s17 }
  0x39   :  { %v82_v24 = vadd.f32 %v81_v19, %v74_v18  ;;  %v89_v25 = vmul.f32 %v88_v16, %v87_v20  ;;  %v95_v26 = vand.u32 2147483647, %v94_v21  ;;  %v102_v27 = vadd.f32 %v101_v23, %v60_v1 }
  0x3a   :  { %v109_v29 = vstv %s158_s19  ;;  %v112_v34 = vstv %s296_s18 }
  0x3b   :  { %v90_v30 = vadd.f32 %v89_v25, %v82_v24  ;;  %v97_v31 = vmul.f32 %v96_v22, %v95_v26  ;;  %v103_v32 = vand.u32 2147483647, %v102_v27  ;;  %v110_v33 = vadd.f32 %v109_v29, %v60_v1 }
  0x3c   :  { %v117_v35 = vstv %s160_s20  ;;  %v120_v40 = vstv %s299_s2 }
  0x3d   :  { %v98_v36 = vadd.f32 %v97_v31, %v90_v30  ;;  %v105_v37 = vmul.f32 %v104_v28, %v103_v32  ;;  %v111_v38 = vand.u32 2147483647, %v110_v33  ;;  %v118_v39 = vadd.f32 %v117_v35, %v60_v1 }
  0x3e   :  { %v125_v41 = vstv %s162_s22  ;;  %v128_v46 = vstv %s302_s21 }
  0x3f   :  { %v106_v42 = vadd.f32 %v105_v37, %v98_v36  ;;  %v113_v43 = vmul.f32 %v112_v34, %v111_v38  ;;  %v119_v44 = vand.u32 2147483647, %v118_v39  ;;  %v126_v45 = vadd.f32 %v125_v41, %v60_v1 }
  0x41   :  { %v114_v47 = vadd.f32 %v113_v43, %v106_v42  ;;  %v121_v48 = vmul.f32 %v120_v40, %v119_v44  ;;  %v127_v49 = vand.u32 2147483647, %v126_v45 }
  0x43   :  { %v122_v50 = vadd.f32 %v121_v48, %v114_v47  ;;  %v129_v51 = vmul.f32 %v128_v46, %v127_v49 }
  0x45   :  { %v130_v52 = vadd.f32 %v129_v51, %v122_v50 }
  0x47   :  { %131 = vst [vmem:[#allocation11] sm:$0xff] %v130_v52 }
  0x48   :  { %222 = shalt.err (!%p219_p5)
}
  0x49   :  { %141 = dma.vmem_to_hbm [thread:$0]  %s139_s24, 128, %s317_s5, [#allocation6]  }
  0x4a   :  { %237 = dma.done.wait [#allocation6], 128  }
  0x4b   :  { %238 = vsyncadd [#allocation6], 4294967168 }
  0x4c   :  { %145 = vsyncpa [#allocation5], 1 }
  0x4d   :  { %146 = vsyncpa [#allocation6], 1 }
  0x4e   :  { %147 = vsyncpa [#allocation7], 1 }
  0x4f   :  { %148 = vsyncpa [#allocation10], 1 }

</bundles_post_ra>
